<compile_context>
chip_gen: v7x
topology: tpu7x:2x2x1
jax: 0.10.0
libtpu: 0.0.40
codegen_flags: <defaults>
</compile_context>

<pallas_src>
import jax
import jax.numpy as jnp
from jax.experimental import pallas as pl
from jax.experimental.pallas import tpu as pltpu

# Lane widths tried widest-first (lane-dense width is the biggest measured
# lever).  All are multiples of 128.
_LANE_CHOICES = (4096, 2048, 1024, 512, 256, 128)
# ~2 MiB blocks hit ~86% of HBM roofline on a mem-bound f32 copy.
_TARGET_BLOCK_BYTES = 2 * 1024 * 1024
# Only split into multiple grid steps above this size (>=2 parallel steps
# lets v7x's two TensorCores both work; neutral on v5e/v6e).
_MULTI_STEP_THRESHOLD_BYTES = 1 * 1024 * 1024


def _identity_kernel(x_ref, o_ref):
    # The original forward does nothing with its inputs; this is a pure
    # HBM-streaming pass-through used only to demonstrate the Pallas path.
    o_ref[...] = x_ref[...]


def _pallas_touch(x: jax.Array) -> jax.Array:
    """Optional on-device pass-through (NOT called by forward())."""
    flat = jnp.reshape(x, (-1,))
    size = flat.shape[0]
    itemsize = jnp.dtype(flat.dtype).itemsize

    # Pick the widest lane count that exactly divides the flattened size so
    # no jnp.pad (an extra full HBM read+write) is ever needed.
    lanes = next((l for l in _LANE_CHOICES if size % l == 0), None)
    if lanes is None:
        # Ragged size: the kernel is an identity, so returning x unchanged is
        # exact; skip the launch rather than paying a pad/slice HBM copy.
        # TODO(synk): handle ragged tails with a masked partial last block if
        # a real (non-identity) touch is ever required.
        return x

    rows = size // lanes
    slab = jnp.reshape(flat, (rows, lanes))
    row_bytes = lanes * itemsize
    total_bytes = rows * row_bytes

    # Row tile: full-array block for small tensors (block == array dims, so
    # the (8,128) divisibility constraint does not apply).  For tensors above
    # ~1 MiB, pick the largest row-divisor that is a multiple of 8, targets
    # ~2 MiB blocks, and yields >=2 parallel grid steps.
    tr = rows
    if (total_bytes > _MULTI_STEP_THRESHOLD_BYTES
            and rows >= 16 and rows % 8 == 0):
        target_rows = max(8, _TARGET_BLOCK_BYTES // row_bytes)
        cand = min(rows // 2, target_rows)
        cand = (cand // 8) * 8
        while cand >= 8:
            if rows % cand == 0:
                tr = cand
                break
            cand -= 8

    out = pl.pallas_call(
        _identity_kernel,
        out_shape=jax.ShapeDtypeStruct((rows, lanes), slab.dtype),
        grid=(rows // tr,),
        in_specs=[pl.BlockSpec((tr, lanes), lambda i: (i, 0))],
        out_specs=pl.BlockSpec((tr, lanes), lambda i: (i, 0)),
        compiler_params=pltpu.CompilerParams(
            dimension_semantics=("parallel",)),
        # Pure HBM streaming: one read + one write of the slab.
        cost_estimate=pl.CostEstimate(
            flops=0, transcendentals=0,
            bytes_accessed=2 * rows * lanes * itemsize),
    )(slab)
    return jnp.reshape(out, x.shape)


class TrainAbstractMetrics:
    """JAX/Pallas port of the (no-op) PyTorch module."""

    def __init__(self):
        # Original __init__ registers no parameters/buffers.
        pass

    def forward(self, masked_pred_epsX, masked_pred_epsE, pred_y,
                true_epsX, true_epsE, true_y, log):
        # The PyTorch forward body is `pass`: no compute, returns None.
        # A no-op must cost nothing: no kernel launches, no HBM traffic.
        return None

    def __call__(self, *args, **kwargs):
        return self.forward(*args, **kwargs)

    def reset(self):
        pass

    def log_epoch_metrics(self):
        return (None, None)


if __name__ == "__main__":
    key = jax.random.PRNGKey(0)
    k1, k2, k3, k4, k5, k6, k7 = jax.random.split(key, 7)

    # Small shapes consistent with the module's (X, E, y) diffusion tensors.
    bs, n, dx, de, dy = 2, 8, 16, 16, 8
    masked_pred_epsX = jax.random.normal(k1, (bs, n, dx), dtype=jnp.float32)
    masked_pred_epsE = jax.random.normal(k2, (bs, n, n, de), dtype=jnp.float32)
    pred_y = jax.random.normal(k3, (bs, dy), dtype=jnp.float32)
    true_epsX = jax.random.normal(k4, (bs, n, dx), dtype=jnp.float32)
    true_epsE = jax.random.normal(k5, (bs, n, n, de), dtype=jnp.float32)
    true_y = jax.random.normal(k6, (bs, dy), dtype=jnp.float32)

    # 1) Exercise the Pallas identity kernel once on a module-shaped tensor
    #    (single wide lane-dense block, grid=(1,)) and block on it.
    touched = _pallas_touch(masked_pred_epsE)
    jax.block_until_ready(touched)
    assert touched.shape == masked_pred_epsE.shape
    assert jnp.allclose(touched, masked_pred_epsE)

    # 2) Exercise the tiled multi-step path (~2 MiB tensor -> 4096 lanes,
    #    ~1 MiB blocks, grid=(2,) parallel steps) to validate the pipelined
    #    configuration compiles and runs.
    big = jax.random.normal(k7, (1024, 512), dtype=jnp.float32)
    touched_big = _pallas_touch(big)
    jax.block_until_ready(touched_big)
    assert jnp.allclose(touched_big, big)

    # Module forward: semantics match PyTorch — does nothing, returns None,
    # and launches zero kernels.
    metrics = TrainAbstractMetrics()
    out = metrics(masked_pred_epsX, masked_pred_epsE, pred_y,
                  true_epsX, true_epsE, true_y, log=True)
    assert out is None
    assert metrics.log_epoch_metrics() == (None, None)
    metrics.reset()

    print("KERNEL_OK")
</pallas_src>

<mosaic_0001>
module attributes {stable_mosaic.version = 11 : i64} {
  func.func @_identity_kernel(%arg0: i32, %arg1: memref<1x2048xf32, #tpu.memory_space<vmem>>, %arg2: memref<1x2048xf32, #tpu.memory_space<vmem>>) attributes {dimension_semantics = [#tpu.dimension_semantics<parallel>], iteration_bounds = array<i64: 1>, scalar_prefetch = 0 : i64, scratch_operands = 0 : i64, tpu.core_type = #tpu.core_type<tc>, window_params = [{transform_indices = @transform_0, window_bounds = array<i64: 1, 2048>}, {transform_indices = @transform_1, window_bounds = array<i64: 1, 2048>}]} {
    %c0 = arith.constant 0 : index
    %c0_0 = arith.constant 0 : index
    %0 = vector.load %arg1[%c0, %c0_0] : memref<1x2048xf32, #tpu.memory_space<vmem>>, vector<1x2048xf32>
    %c0_1 = arith.constant 0 : index
    %c0_2 = arith.constant 0 : index
    %1 = vector.load %arg2[%c0_1, %c0_2] : memref<1x2048xf32, #tpu.memory_space<vmem>>, vector<1x2048xf32>
    tpu.vector_store %arg2[%c0_1, %c0_2], %0 {strides = array<i32>} : memref<1x2048xf32, #tpu.memory_space<vmem>>, vector<1x2048xf32>,
    return
  }
  func.func @transform_0(%arg0: i32) -> (i32, i32) {
    %c0_i32 = arith.constant 0 : i32
    %c0_i32_0 = arith.constant 0 : i32
    return %arg0, %c0_i32 : i32, i32
  }
  func.func @transform_1(%arg0: i32) -> (i32, i32) {
    %c0_i32 = arith.constant 0 : i32
    %c0_i32_0 = arith.constant 0 : i32
    return %arg0, %c0_i32 : i32, i32
  }
}

</mosaic_0001>

<bundles_post_ra>
// kernel: tpu_custom_call.1
= control target key start
LH: loop header
LB: loop body
LE: loop exit
PB: predicated region body
PF: predicated region fallthrough
CT: control target
= control target key end

     0   :  { %6 = vsyncpa [#allocation3], 0  ;;  %s126_s0 = inlined_call_operand.hbm [shape: f32[1,2048], index: 0, kind: input, shape index: {}]   ;;  %s127_s1 = inlined_call_operand.hbm [shape: f32[1,2048], index: 1, kind: output, shape index: {}]  }
   0x1   :  { %7 = vsyncpa [#allocation4], 0  ;;  %s90_s6 = smov [#allocation2]   ;;  %s42_s10 = scalar_lea.hbm %s126_s0, 256 }
   0x2   :  { %s14_s7 = sshll.u32 %s90_s6, 4  ;;  %p43_p0 = scmp.ne.s32.totalorder %s126_s0, %s42_s10  ;;  %s15_s7 = int_to_ptr.vmem [resolvable:$true] %s14_s7 }
   0x3   :  { %p46_p1 = scmp.lt.u32.totalorder %s42_s10, %s126_s0 }
   0x5   :  { %p48_p2 = pnand %p46_p1, %p43_p0 }
   0x7   :  { %51 = shalt.err (!%p48_p2)
}
   0x8   :  { %s52_s15 = scalar_lea.vmem %s15_s7, 256  ;;  %p57_p4 = scmp.lt.s32.totalorder %s15_s7, %s15_s7 }
   0x9   :  { %p53_p3 = scmp.ne.s32.totalorder %s15_s7, %s52_s15  ;;  %p58_p5 = scmp.lt.s32.totalorder %s52_s15, %s52_s15 }
   0xb   :  { %p59_p6 = por %p58_p5, %p57_p4 }
   0xd   :  { %p60_p7 = pnand %p59_p6, %p53_p3 }
   0xf   :  { %63 = shalt.err (!%p60_p7)
}
  0x10   :  { %17 = dma.hbm_to_vmem [thread:$0]  %s126_s0, 256, %s15_s7, [#allocation3]  }
  0x11   :  { %86 = dma.done.wait [#allocation3], 256  }
  0x12   :  { %87 = vsyncadd [#allocation3], 4294967040  ;;  %s91_s18 = smov [#allocation5]   ;;  %v21_v0 = vld [vmem:[#allocation2] sm:$0xff]  ;;  %v22_v1 = vld [vmem:[#allocation2 + $0x8] sm:$0xff] }
  0x13   :  { %s31_s19 = sshll.u32 %s91_s18, 4  ;;  %23 = vst [vmem:[#allocation5] sm:$0xff] %v21_v0  ;;  %24 = vst [vmem:[#allocation5 + $0x8] sm:$0xff] %v22_v1  ;;  %s32_s19 = int_to_ptr.vmem [resolvable:$true] %s31_s19 }
  0x14   :  { %s64_s20 = scalar_lea.vmem %s32_s19, 256  ;;  %p69_p9 = scmp.lt.s32.totalorder %s32_s19, %s32_s19 }
  0x15   :  { %p65_p8 = scmp.ne.s32.totalorder %s32_s19, %s64_s20  ;;  %p70_p10 = scmp.lt.s32.totalorder %s64_s20, %s64_s20 }
  0x17   :  { %p71_p11 = por %p70_p10, %p69_p9 }
  0x19   :  { %p72_p12 = pnand %p71_p11, %p65_p8 }
  0x1b   :  { %75 = shalt.err (!%p72_p12)
}
  0x1c   :  { %s76_s0 = scalar_lea.hbm %s127_s1, 256 }
  0x1d   :  { %p77_p13 = scmp.ne.s32.totalorder %s127_s1, %s76_s0  ;;  %p80_p0 = scmp.lt.u32.totalorder %s76_s0, %s127_s1 }
  0x1f   :  { %p82_p1 = pnand %p80_p0, %p77_p13 }
  0x21   :  { %85 = shalt.err (!%p82_p1)
}
  0x22   :  { %34 = dma.vmem_to_hbm [thread:$0]  %s32_s19, 256, %s127_s1, [#allocation4]  }
  0x23   :  { %88 = dma.done.wait [#allocation4], 256  }
  0x24   :  { %89 = vsyncadd [#allocation4], 4294967040 }
  0x25   :  { %38 = vsyncpa [#allocation3], 1 }
  0x26   :  { %39 = vsyncpa [#allocation4], 1 }

</bundles_post_ra>
